<compile_context>
chip_gen: v7x
topology: tpu7x:2x2x1
jax: 0.10.0
libtpu: 0.0.40
codegen_flags: <defaults>
</compile_context>

<pallas_src>
import functools

import jax
import jax.numpy as jnp
from jax.experimental import pallas as pl
from jax.experimental.pallas import tpu as pltpu


def _round_up(x: int, m: int) -> int:
    return ((x + m - 1) // m) * m


def _vmem_capacity_bytes() -> int:
    """Physical VMEM of the local TPU; conservative 64 MiB (v7x) fallback."""
    try:
        return int(pltpu.get_tpu_info().vmem_capacity_bytes)
    except Exception:
        return 64 * 1024 * 1024


def _choose_tile_n(n: int, d_model: int, out_width: int,
                   x_itemsize: int, out_itemsize: int, w_itemsize: int,
                   vmem_budget_bytes: int) -> int:
    """Row tile: as large as the VMEM budget allows (minus the resident
    weight/bias double-buffers and f32 intermediates), but small enough that
    the grid has multiple steps (pipelining + v7x dual-TensorCore)."""
    # Resident weight + bias (Pallas double-buffers them even though their
    # block index is constant; Buffered(1) would halve this — kept simple).
    resident = 2 * (out_width * d_model * w_itemsize + out_width * 4)
    avail = max(vmem_budget_bytes - resident, 1 << 20)
    # Per row: x double-buffer + out double-buffer + f32 logits/exp temporaries.
    per_row = 2 * d_model * x_itemsize + 2 * out_width * out_itemsize + 2 * out_width * 4
    vmem_cap_rows = max(8, (avail // per_row) // 8 * 8)

    # Guarantee a multi-step grid when there is enough work.
    if n >= 32:
        min_steps = 4
    elif n >= 16:
        min_steps = 2
    else:
        min_steps = 1
    step_cap = _round_up(pl.cdiv(n, min_steps), 8)

    tile = min(1024, vmem_cap_rows, step_cap, _round_up(max(n, 1), 8))
    return max(8, (tile // 8) * 8)


def _policy_head_kernel(x_ref, w_ref, b_ref, logp_ref, *, action_dim: int):
    # x_ref:    [TILE_N, d_model]     (row tile, double-buffered)
    # w_ref:    [d_model, out_width]  (pre-transposed, VMEM-resident)
    # b_ref:    [1, out_width]        (resident; padded lanes hold 0, masked below)
    # logp_ref: [TILE_N, out_width]   normalized log-probs (Categorical.logits)
    x = x_ref[...]
    # Documented deviation: weight is cast to the activation dtype for the MXU
    # (no-op when both are f32, as in this test / the PyTorch default).
    w = w_ref[...].astype(x.dtype)

    # logits = x @ W : contraction is (1,)x(0,) — weight arrives pre-transposed
    # so no in-kernel transpose; accumulate in f32 on the MXU.
    logits = jax.lax.dot_general(
        x, w,
        dimension_numbers=(((1,), (0,)), ((), ())),
        preferred_element_type=jnp.float32)
    logits = (logits + b_ref[...].astype(jnp.float32)) * 0.01

    # Mask padded action lanes AFTER scaling, in f32, with -inf: exp -> 0, so
    # the softmax normalizer only sees the real action_dim lanes.
    if action_dim < logits.shape[-1]:
        col = jax.lax.broadcasted_iota(jnp.int32, logits.shape, 1)
        logits = jnp.where(col < action_dim, logits, -jnp.inf)

    # Categorical(logits=...) normalization: logits - logsumexp(logits, -1).
    m = jnp.max(logits, axis=-1, keepdims=True)
    z = logits - m
    lse = jnp.log(jnp.sum(jnp.exp(z), axis=-1, keepdims=True))
    logp_ref[...] = (z - lse).astype(logp_ref.dtype)


def policy_head_logprobs(x, weight, bias, *, tile_n=None, out_dtype=None,
                         slice_output=True):
    """x: [..., d_model] -> normalized Categorical log-probs [..., action_dim].

    weight: [action_dim, d_model] (PyTorch nn.Linear layout), bias: [action_dim].
    """
    d_model = x.shape[-1]
    action_dim = weight.shape[0]
    lead = x.shape[:-1]
    xf = x.reshape(-1, d_model)
    n = xf.shape[0]
    out_dtype = x.dtype if out_dtype is None else jnp.dtype(out_dtype)
    out_itemsize = jnp.dtype(out_dtype).itemsize

    # Lane-dense output: always pad action_dim up to a multiple of 128 (the
    # extra write bytes are tiny vs. the x reads; unmasked full-width stores).
    out_width = _round_up(action_dim, 128)
    pad = out_width - action_dim
    # One-time transform of the tiny weight: pad rows, transpose -> [d_model, out_width].
    w_k = jnp.pad(weight, ((0, pad), (0, 0))).T
    b2d = jnp.pad(bias, ((0, pad),)).reshape(1, out_width)

    vmem_cap = _vmem_capacity_bytes()
    vmem_budget = (vmem_cap * 3) // 4  # ~96 MiB on v5e/v6e, ~48 MiB on v7x
    if tile_n is None:
        tile_n = _choose_tile_n(n, d_model, out_width,
                                xf.dtype.itemsize, out_itemsize,
                                w_k.dtype.itemsize, vmem_budget)

    # NO row padding of x: Pallas masks the partial last block.
    grid = (pl.cdiv(n, tile_n),)

    # Explicit scoped-VMEM limit covering the double-buffered x/out tiles, the
    # resident weight/bias double-buffers and the f32 intermediates.
    est_vmem = (2 * tile_n * d_model * xf.dtype.itemsize
                + 2 * tile_n * out_width * out_itemsize
                + 2 * w_k.size * w_k.dtype.itemsize
                + 2 * b2d.size * b2d.dtype.itemsize
                + 2 * tile_n * out_width * 4)
    vmem_limit = int(min(vmem_cap * 9 // 10,
                         max(32 * 1024 * 1024, est_vmem + (16 << 20))))

    cost = pl.CostEstimate(
        flops=2 * n * d_model * out_width,
        transcendentals=n * out_width,  # exp in the softmax
        bytes_accessed=(xf.size * xf.dtype.itemsize
                        + w_k.size * w_k.dtype.itemsize
                        + b2d.size * b2d.dtype.itemsize
                        + n * out_width * out_itemsize))

    out = pl.pallas_call(
        functools.partial(_policy_head_kernel, action_dim=action_dim),
        out_shape=jax.ShapeDtypeStruct((n, out_width), out_dtype),
        grid_spec=pltpu.PrefetchScalarGridSpec(
            num_scalar_prefetch=0,
            grid=grid,
            in_specs=[
                # x: row-tiled -> double-buffered by the Pallas pipeline.
                pl.BlockSpec((tile_n, d_model), lambda i: (i, 0)),
                # weight / bias: constant block index -> stay resident in VMEM.
                pl.BlockSpec((d_model, out_width), lambda i: (0, 0)),
                pl.BlockSpec((1, out_width), lambda i: (0, 0)),
            ],
            out_specs=pl.BlockSpec((tile_n, out_width), lambda i: (i, 0)),
        ),
        compiler_params=pltpu.CompilerParams(
            dimension_semantics=("parallel",),  # independent rows -> 2 TCs on v7x
            vmem_limit_bytes=vmem_limit),
        cost_estimate=cost,
    )(xf, w_k, b2d)

    if slice_output:
        out = out[:, :action_dim]
        return out.reshape(*lead, action_dim)
    # Consumer masks invalid actions itself (padded lanes hold -inf log-probs).
    return out.reshape(*lead, out_width)


def _reference(x, weight, bias):
    logits = (jnp.matmul(x, weight.T, precision=jax.lax.Precision.HIGHEST)
              + bias) / 100.0
    return jax.nn.log_softmax(logits, axis=-1)


if __name__ == "__main__":
    key = jax.random.PRNGKey(0)

    # Case 1: small shapes consistent with the module (batch=2, seq=8,
    # d_model=32, action_dim=16) — multi-step grid, lane-padded output.
    B, T, D_MODEL, ACTION_DIM = 2, 8, 32, 16
    kx, kw, kb, key2 = jax.random.split(key, 4)
    bound = 1.0 / (D_MODEL ** 0.5)
    weight = jax.random.uniform(kw, (ACTION_DIM, D_MODEL), jnp.float32, -bound, bound)
    bias = jax.random.uniform(kb, (ACTION_DIM,), jnp.float32, -bound, bound)
    x = jax.random.normal(kx, (B, T, D_MODEL), jnp.float32)

    log_probs = policy_head_logprobs(x, weight, bias)
    jax.block_until_ready(log_probs)
    assert log_probs.shape == (B, T, ACTION_DIM)
    assert jnp.allclose(log_probs, _reference(x, weight, bias), atol=1e-4), \
        "mismatch vs reference (case 1)"

    # Case 2: larger d_model + uneven N (no host-side row padding any more —
    # exercises the partial last block) and the lane-padded -inf-masked path.
    B2, T2, D2, A2 = 3, 5, 512, 16
    kx2, kw2, kb2 = jax.random.split(key2, 3)
    bound2 = 1.0 / (D2 ** 0.5)
    weight2 = jax.random.uniform(kw2, (A2, D2), jnp.float32, -bound2, bound2)
    bias2 = jax.random.uniform(kb2, (A2,), jnp.float32, -bound2, bound2)
    x2 = jax.random.normal(kx2, (B2, T2, D2), jnp.float32)

    log_probs2 = policy_head_logprobs(x2, weight2, bias2)
    jax.block_until_ready(log_probs2)
    assert log_probs2.shape == (B2, T2, A2)
    assert jnp.allclose(log_probs2, _reference(x2, weight2, bias2), atol=1e-4), \
        "mismatch vs reference (case 2)"

    print("KERNEL_OK")
</pallas_src>

<mosaic_0001>
module attributes {stable_mosaic.version = 11 : i64} {
  func.func @_policy_head_kernel(%arg0: i32, %arg1: memref<8x32xf32, #tpu.memory_space<vmem>>, %arg2: memref<32x128xf32, #tpu.memory_space<vmem>>, %arg3: memref<1x128xf32, #tpu.memory_space<vmem>>, %arg4: memref<8x128xf32, #tpu.memory_space<vmem>>) attributes {dimension_semantics = [#tpu.dimension_semantics<parallel>], iteration_bounds = array<i64: 2>, scalar_prefetch = 0 : i64, scratch_operands = 0 : i64, tpu.core_type = #tpu.core_type<tc>, window_params = [{transform_indices = @transform_0, window_bounds = array<i64: 8, 32>}, {pipeline_mode = #tpu.pipeline_mode<synchronous>, transform_indices = @transform_1, window_bounds = array<i64: 32, 128>}, {pipeline_mode = #tpu.pipeline_mode<synchronous>, transform_indices = @transform_2, window_bounds = array<i64: 1, 128>}, {transform_indices = @transform_3, window_bounds = array<i64: 8, 128>}]} {
    %c0 = arith.constant 0 : index
    %c0_0 = arith.constant 0 : index
    %0 = vector.load %arg1[%c0, %c0_0] : memref<8x32xf32, #tpu.memory_space<vmem>>, vector<8x32xf32>
    %c0_1 = arith.constant 0 : index
    %c0_2 = arith.constant 0 : index
    %1 = vector.load %arg2[%c0_1, %c0_2] : memref<32x128xf32, #tpu.memory_space<vmem>>, vector<32x128xf32>
    %cst = arith.constant dense<0.000000e+00> : vector<8x128xf32>
    %2 = tpu.matmul %0, %1, %cst {dimension_numbers = #tpu.dot_dimension_numbers<[1], [0], [0], [1], [0, 0, 1, 1], [], []>} : vector<8x32xf32>, vector<32x128xf32>, vector<8x128xf32> -> vector<8x128xf32>
    %c0_3 = arith.constant 0 : index
    %c0_4 = arith.constant 0 : index
    %3 = vector.load %arg3[%c0_3, %c0_4] : memref<1x128xf32, #tpu.memory_space<vmem>>, vector<1x128xf32>
    %4 = vector.broadcast %3 : vector<1x128xf32> to vector<8x128xf32>
    %5 = arith.addf %2, %4 : vector<8x128xf32>
    %cst_5 = arith.constant 0.00999999977 : f32
    %6 = vector.broadcast %cst_5 : f32 to vector<8x128xf32>
    %7 = arith.mulf %5, %6 : vector<8x128xf32>
    %8 = tpu.iota {dimensions = array<i32: 1>} : vector<8x128xi32>
    %c16_i32 = arith.constant 16 : i32
    %9 = vector.broadcast %c16_i32 : i32 to vector<8x128xi32>
    %10 = arith.cmpi slt, %8, %9 : vector<8x128xi32>
    %cst_6 = arith.constant 0xFF800000 : f32
    %11 = vector.broadcast %cst_6 : f32 to vector<8x128xf32>
    %12 = arith.select %10, %7, %11 : vector<8x128xi1>, vector<8x128xf32>
    %cst_7 = arith.constant dense<0xFF800000> : vector<8xf32>
    %13 = vector.multi_reduction <maximumf>, %12, %cst_7 [1] : vector<8x128xf32> to vector<8xf32>
    %14 = vector.shape_cast %13 : vector<8xf32> to vector<8x1xf32>
    %15 = vector.broadcast %14 : vector<8x1xf32> to vector<8x128xf32>
    %16 = arith.subf %12, %15 : vector<8x128xf32>
    %17 = math.exp %16 : vector<8x128xf32>
    %cst_8 = arith.constant dense<0.000000e+00> : vector<8xf32>
    %18 = vector.multi_reduction <add>, %17, %cst_8 [1] : vector<8x128xf32> to vector<8xf32>
    %19 = vector.shape_cast %18 : vector<8xf32> to vector<8x1xf32>
    %20 = math.log %19 : vector<8x1xf32>
    %21 = vector.broadcast %20 : vector<8x1xf32> to vector<8x128xf32>
    %22 = arith.subf %16, %21 : vector<8x128xf32>
    %c0_9 = arith.constant 0 : index
    %c0_10 = arith.constant 0 : index
    %23 = vector.load %arg4[%c0_9, %c0_10] : memref<8x128xf32, #tpu.memory_space<vmem>>, vector<8x128xf32>
    tpu.vector_store %arg4[%c0_9, %c0_10], %22 {strides = array<i32>} : memref<8x128xf32, #tpu.memory_space<vmem>>, vector<8x128xf32>,
    return
  }
  func.func @transform_0(%arg0: i32) -> (i32, i32) {
    %c0_i32 = arith.constant 0 : i32
    %c0_i32_0 = arith.constant 0 : i32
    return %arg0, %c0_i32 : i32, i32
  }
  func.func @transform_1(%arg0: i32) -> (i32, i32) {
    %c0_i32 = arith.constant 0 : i32
    %c0_i32_0 = arith.constant 0 : i32
    %c0_i32_1 = arith.constant 0 : i32
    return %c0_i32, %c0_i32_0 : i32, i32
  }
  func.func @transform_2(%arg0: i32) -> (i32, i32) {
    %c0_i32 = arith.constant 0 : i32
    %c0_i32_0 = arith.constant 0 : i32
    %c0_i32_1 = arith.constant 0 : i32
    return %c0_i32, %c0_i32_0 : i32, i32
  }
  func.func @transform_3(%arg0: i32) -> (i32, i32) {
    %c0_i32 = arith.constant 0 : i32
    %c0_i32_0 = arith.constant 0 : i32
    return %arg0, %c0_i32 : i32, i32
  }
}

</mosaic_0001>

<bundles_post_ra>
// kernel: tpu_custom_call.1
= control target key start
LH: loop header
LB: loop body
LE: loop exit
PB: predicated region body
PF: predicated region fallthrough
CT: control target
= control target key end

     0   :  { %8 = vsyncpa [#allocation3], 0  ;;  %s862_s0 = inlined_call_operand.hbm [shape: f32[16,32], index: 0, kind: input, shape index: {}]   ;;  %s863_s1 = inlined_call_operand.hbm [shape: f32[32,128], index: 1, kind: input, shape index: {}]   ;;  %s864_s2 = inlined_call_operand.vmem [shape: f32[1,128], index: 2, kind: input, shape index: {}]   ;;  %s865_s3 = inlined_call_operand.hbm [shape: f32[16,128], index: 3, kind: output, shape index: {}]  }
   0x1   :  { %10 = vsyncpa [#allocation3 + $0x1], 0 }
   0x2   :  { %11 = vsyncpa [#allocation6], 0 }
   0x3   :  { %12 = vsyncpa [#allocation4], 0 }
   0x4   :  { %14 = vsyncpa [#allocation4 + $0x1], 0  ;;  %s659_s12 = smov 0   ;;  %s661_s13 = smov 0  }
   0x5   :  { %s663_s14 = smov 0   ;;  %s665_s15 = smov 0  }
   0x6 LB: > { %s680_s16 = sadd.s32 4294967295, %s629_s15   ;;  %s397_s17 = sadd.s32 4294967294, %s629_s15   ;;  %s629_s15 = sphi %s665_s15, %s885_s15   ;;  %s625_s14 = sphi %s663_s14, %s884_s14   ;;  %s621_s13 = sphi %s661_s13, %s883_s13   ;;  %s617_s12 = sphi %s659_s12, %s882_s12  }
   0x7   : > { %p40_p0 = scmp.ne.s32.totalorder %s621_s13, %s617_s12  ;;  %p866_p1 = scmp.eq.s32.totalorder %s680_s16, 0 }
   0x8   : > { %p112_p3 = scmp.eq.s32.totalorder %s397_s17, 1  ;;  %p398_p5 = scmp.ge.s32.totalorder %s629_s15, 1 }
   0x9   : > { %p689_p4 = por %p866_p1, %p40_p0  ;;  %p119_p7 = scmp.lt.s32.totalorder %s629_s15, 3 }
   0xa   : > { %p694_p6 = por %p112_p3, %p40_p0  ;;  %s631_s21 = smov [#allocation5]  }
   0xb   : > { %s869_s18 = scalar_select %p689_p4, 1, 0 }
   0xc   : > { %s870_s19 = scalar_select %p694_p6, 1, 0 }
   0xd   : > { %p699_p8 = pnand %p398_p5, %p119_p7  ;;  %s131_s22 = sshll.u32 %s631_s21, 4  ;;  %s703_s22 = int_to_ptr.vmem [resolvable:$true] %s131_s22 }
   0xe   : > { %s715_s24 = sadd.s32 1, %s629_s15   ;;  %s27_s25 = sadd.s32 1, %s625_s14 }
   0xf   : > { %s871_s20 = scalar_select %p699_p8, 1, 0 }
  0x10   : > { %p443_p9 = pneg %p699_p8  ;;  %s24_s26 = ssub.s32 %s629_s15, %s715_s24 }
  0x11   : > { %s501_s29 = scalar_lea.hbm %s863_s1, 512 }
  0x12   : > { %p710_p11 = pnand %p443_p9, %p866_p1  ;;  %p502_p12 = scmp.ne.s32.totalorder %s863_s1, %s501_s29 }
  0x13   : > { %p508_p5 = scmp.lt.u32.totalorder %s501_s29, %s863_s1 }
  0x14   : > { %p503_p13 = pneg %p710_p11 }
  0x16   : > { %p504_p0 = pnand %p503_p13, %p502_p12 }
  0x18   : > { %p505_p3 = pneg %p504_p0 }
  0x1a   : > { %p510_p7 = pnand %p508_p5, %p505_p3 }
  0x1c   : > { %513 = shalt.err (!%p510_p7)
}
  0x1d   : > { %s514_s7 = scalar_lea.vmem %s703_s22, 512  ;;  %p522_p2 = scmp.lt.s32.totalorder %s703_s22, %s703_s22 }
  0x1e   : > { %p515_p9 = scmp.ne.s32.totalorder %s703_s22, %s514_s7  ;;  %p523_p6 = scmp.lt.s32.totalorder %s514_s7, %s514_s7 }
  0x20   : > { %p517_p10 = pnand %p515_p9, %p503_p13  ;;  %p524_p4 = por %p523_p6, %p522_p2 }
  0x22   : > { %p518_p1 = pneg %p517_p10 }
  0x24   : > { %p525_p8 = pnand %p524_p4, %p518_p1 }
  0x26   : > { %528 = shalt.err (!%p525_p8)
}
  0x27   : > { %s632_s8 = smov 128   ;;  %s633_s9 = smov 8  }
  0x28   : > { %446 = dma.hbm_to_vmem [thread:$0]  (!%p710_p11), %s863_s1, 512, %s703_s22, [#allocation6], %s632_s8, %s632_s8, %s633_s9  }
  0x29   : > { %p25_p2 = scmp.eq.s32.totalorder %s24_s26, 0  ;;  %p34_p1 = scmp.ne.s32.totalorder %s625_s14, %s621_s13 }
  0x2a   : > { %p35_p4 = scmp.eq.s32.totalorder %s629_s15, 0  ;;  %p456_p6 = scmp.lt.s32.totalorder %s629_s15, 2 }
  0x2b   : > { %s746_s17 = scalar_select %p25_p2, %s625_s14, %s27_s25  }
  0x2c   : > { %p36_p8 = por %p35_p4, %p34_p1  ;;  %p873_p10 = scmp.eq.s32.totalorder %s680_s16, 1 }
  0x2d   : > { %s148_s27 = sand.u32 1, %s625_s14   ;;  %s402_s28 = sshll.u32 %s629_s15, 7 }
  0x2e   : > { %p750_p12 = por %p873_p10, %p34_p1  ;;  %s401_s29 = sshll.u32 %s148_s27, 3 }
  0x2f   : > { %s759_s4 = scalar_lea.hbm %s862_s0, %s402_s28  ;;  %s152_s22 = scalar_lea.vmem [#allocation2], %s401_s29 }
  0x30   : > { %s159_s25 = sshll.u32 %s152_s22, 4  ;;  %p761_p11 = pnand %p456_p6, %p36_p8  ;;  %s765_s25 = int_to_ptr.vmem [resolvable:$true] %s159_s25 }
  0x31   : > { %s149_s5 = scalar_lea.sflag [#allocation3], %s148_s27  ;;  %s529_s6 = scalar_lea.hbm %s759_s4, 128 }
  0x32   : > { %p530_p13 = scmp.ne.s32.totalorder %s759_s4, %s529_s6  ;;  %p531_p0 = pneg %p761_p11 }
  0x33   : > { %s534_s9 = scalar_lea.hbm %s862_s0, 256  ;;  %p535_p7 = scmp.lt.u32.totalorder %s759_s4, %s862_s0 }
  0x34   : > { %p532_p3 = pnand %p531_p0, %p530_p13  ;;  %p536_p9 = scmp.lt.u32.totalorder %s534_s9, %s529_s6 }
  0x35   : > { %p538_p1 = scmp.lt.u32.totalorder %s529_s6, %s759_s4 }
  0x36   : > { %p533_p5 = pneg %p532_p3  ;;  %p537_p2 = por %p536_p9, %p535_p7 }
  0x38   : > { %p539_p4 = por %p538_p1, %p537_p2 }
  0x3a   : > { %p540_p6 = pnand %p539_p4, %p533_p5 }
  0x3c   : > { %543 = shalt.err (!%p540_p6)
}
  0x3d   : > { %s544_s27 = scalar_lea.vmem %s765_s25, 128  ;;  %s634_s28 = smov [#allocation2]  }
  0x3e   : > { %p545_p8 = scmp.ne.s32.totalorder %s765_s25, %s544_s27  ;;  %s549_s29 = sshll.u32 %s634_s28, 4  ;;  %s550_s29 = int_to_ptr.vmem [resolvable:$false] %s549_s29 }
  0x3f   : > { %s551_s23 = scalar_lea.vmem %s550_s29, 256  ;;  %p552_p3 = scmp.lt.s32.totalorder %s765_s25, %s550_s29 }
  0x40   : > { %p547_p10 = pnand %p545_p8, %p531_p0  ;;  %p553_p7 = scmp.lt.s32.totalorder %s551_s23, %s544_s27 }
  0x42   : > { %p548_p13 = pneg %p547_p10  ;;  %p554_p9 = por %p553_p7, %p552_p3 }
  0x44   : > { %p555_p2 = pnand %p554_p9, %p548_p13 }
  0x46   : > { %558 = shalt.err (!%p555_p2)
}
  0x47   : > { %450 = dma.hbm_to_vmem [thread:$0]  (!%p761_p11), %s759_s4, 128, %s765_s25, %s149_s5  }
  0x48   : > { %p876_p5 = scmp.ne.s32.totalorder %s871_s20, 0 }
  0x49   : > { %s795_s30 = sand.u32 (!%p876_p5), 1, %s621_s13   ;;  %p877_p0 = scmp.ne.s32.totalorder (!%p876_p5), %s869_s18, 0 }
  0x4a   : > { %168 = sbr.rel (%p876_p5) target bundleno = 640 (0x280), region = 32  ;;  %s404_s22 = sshll.u32 (!%p876_p5), %s795_s30, 3 }
  0x4b   : > { %s171_s6 = scalar_lea.sflag (!%p876_p5), [#allocation3], %s795_s30  ;;  %s174_s7 = scalar_lea.vmem (!%p876_p5), [#allocation2], %s404_s22 }
  0x51   : > { %604 = dma.done.wait (%p877_p0), %s171_s6, 128  }
  0x52   : > { %606 = vsyncadd (%p877_p0), %s171_s6, 4294967168  ;;  %p878_p11 = scmp.eq.s32.totalorder %s680_s16, 0 }
  0x54   : > { %608 = dma.done.wait (%p878_p11), [#allocation6], 512   ;;  %p879_p1 = pmov %p878_p11 }
  0x55   : > { %v635_v0 = vmov 0.0|0.0   ;;  %vm636_vm0 = vmmov 0   ;;  %v637_v1 = vmov 0.0   ;;  %v202_v2 = vld [vmem:[#allocation5] sm:$0xff]  ;;  %v203_v3 = vld [vmem:[#allocation5 + $0x8] sm:$0xff]  ;;  %v204_v4 = vld [vmem:[#allocation5 + $0x10] sm:$0xff]  ;;  %v288_v9 = vlaneseq }
  0x56   : > { %610 = vsyncadd (%p879_p1), [#allocation6], 4294966784  ;;  %429 = vmatprep.subr.bf16.mxu0 %v635_v0  ;;  %426 = vmatprep.mubr.msk.f32.mxu0 %vm636_vm0, %v637_v1  ;;  %v430_v5 = vpack.c.bf16 %v203_v3, %v202_v2  ;;  %v205_v6 = vld [vmem:[#allocation5 + $0x18] sm:$0xff]  ;;  %vm213_vm1 = vcmask 261120   ;;  %v407_v10 = vld [vmem:[%s864_s2] ss:$0 sm:$0xff] }
  0x57   : > { %v433_v7 = vpack.c.bf16 %v205_v6, %v204_v4  ;;  %v201_v8 = vld [vmem:[%s174_s7] sm:$0xff]  ;;  %v289_v11 = vand.u32 127, %v288_v9  ;;  %s410_s4 = sshll.u32 %s680_s16, 7  ;;  %s200_s25 = scalar_lea.vmem [#allocation7], %s404_s22 }
  0x58   : > { %431 = vmatpush3.bf16.msra.mxu0 %v430_v5  ;;  %s317_s26 = sshll.u32 %s200_s25, 4  ;;  %s818_s9 = scalar_lea.hbm %s865_s3, %s410_s4  ;;  %s820_s26 = int_to_ptr.vmem [resolvable:$true] %s317_s26 }
  0x59   : > { %432 = vmatprep.subr.bf16.mxu0 %v635_v0  ;;  %vm290_vm2 = vcmp.lt.s32.totalorder %v289_v11, 16  ;;  %s304_s10 = scalar_lea.sflag [#allocation4], %s795_s30  ;;  %s559_s11 = scalar_lea.vmem %s820_s26, 128 }
  0x5a   : > { %p560_p4 = scmp.ne.s32.totalorder %s820_s26, %s559_s11  ;;  %s638_s16 = smov [#allocation7]  }
  0x5b   : > { %s563_s27 = sshll.u32 %s638_s16, 4  ;;  %s564_s27 = int_to_ptr.vmem [resolvable:$false] %s563_s27 }
  0x5c   : > { %434 = vmatpush3.bf16.msra.mxu0 %v433_v7  ;;  %p561_p6 = pnand %p560_p4, %p750_p12  ;;  %s565_s28 = scalar_lea.vmem %s564_s27, 256 }
  0x5d   : > { %p566_p10 = scmp.lt.s32.totalorder %s820_s26, %s564_s27  ;;  %p567_p13 = scmp.lt.s32.totalorder %s565_s28, %s559_s11 }
  0x5e   : > { %p562_p8 = pneg %p561_p6 }
  0x5f   : > { %427 = vmatmul.mubr.msk.f32.vlgmr.msra.gmra.mrb[0].mxu0 %vm213_vm1, %v201_v8  ;;  %p568_p3 = por %p567_p13, %p566_p10 }
  0x61   : > { %p569_p7 = pnand %p568_p3, %p562_p8 }
 0x132   : > { %v283_v12 = vpop.f32.mrb[0].mxu0 }
 0x133   : > { %v284_v13 = vadd.f32 %v407_v10, %v283_v12  ;;  %v428_v14 = vpop.f32.mrb[1].mxu0 }
 0x135   : > { %v287_v15 = vmul.f32 0.01, %v284_v13 }
 0x137   : > { %v291_v16 = vsel %vm290_vm2, %v287_v15, -inf }
 0x138   : > { %292 = vmax.xlane.f32.xlu0 %v291_v16 }
 0x1c5   : > { %v293_v17 = vpop.xlane.xlu0 %292 }
 0x1c6   : > { %v294_v18 = vsub.f32 %v291_v16, %v293_v17 }
 0x1c8   : > { %v295_v19 = vmul.f32 1.442695, %v294_v18 }
 0x1ca   : > { %497 = vpow2.f32 %v295_v19 }
 0x1d4   : > { %v498_v20 = vpop.eup %497 }
 0x1d5   : > { %297 = vadd.xlane.f32.xlu0 %v498_v20 }
 0x262   : > { %v298_v21 = vpop.xlane.xlu0 %297 }
 0x263   : > { %499 = vlog2.f32 %v298_v21 }
 0x26d   : > { %v500_v22 = vpop.eup %499 }
 0x26e   : > { %v300_v23 = vmul.f32 0.6931472, %v500_v22 }
 0x270   : > { %v301_v24 = vsub.f32 %v294_v18, %v300_v23 }
 0x272   : > { %302 = vst [vmem:[%s200_s25] sm:$0xff] %v301_v24 }
 0x273   : > { %572 = shalt.err (!%p569_p7)
}
 0x274   : > { %s573_s29 = scalar_lea.hbm %s818_s9, 128  ;;  %s577_s22 = scalar_lea.hbm %s865_s3, 256 }
 0x275   : > { %p574_p9 = scmp.ne.s32.totalorder %s818_s9, %s573_s29  ;;  %p578_p0 = scmp.lt.u32.totalorder %s818_s9, %s865_s3 }
 0x276   : > { %p579_p11 = scmp.lt.u32.totalorder %s577_s22, %s573_s29  ;;  %p581_p4 = scmp.lt.u32.totalorder %s573_s29, %s818_s9 }
 0x277   : > { %p575_p2 = pnand %p574_p9, %p750_p12 }
 0x278   : > { %p580_p1 = por %p579_p11, %p578_p0 }
 0x279   : > { %p576_p5 = pneg %p575_p2 }
 0x27a   : > { %p582_p6 = por %p581_p4, %p580_p1 }
 0x27c   : > { %p583_p8 = pnand %p582_p6, %p576_p5 }
 0x27e   : > { %586 = shalt.err (!%p583_p8)
}
 0x27f   : > { %441 = dma.vmem_to_hbm [thread:$0]  (%p750_p12), %s820_s26, 128, %s818_s9, %s304_s10  }
 0x280 PF: > { %s329_s18 = sand.u32 1, %s617_s12   ;;  %p880_p10 = scmp.ne.s32.totalorder %s870_s19, 0 }
 0x281   : > { %p881_p13 = scmp.ge.s32.totalorder %s629_s15, 2  ;;  %s330_s20 = scalar_lea.sflag [#allocation4], %s329_s18 }
 0x283   : > { %p452_p3 = pnand %p881_p13, %p880_p10 }
 0x285   : > { %612 = dma.done.wait (!%p452_p3), %s330_s20, 128  }
 0x286   : > { %614 = vsyncadd (!%p452_p3), %s330_s20, 4294967168  ;;  %p17_p7 = scmp.ge.s32.totalorder %s715_s24, 4   ;;  %s882_s12 = smov %s621_s13 }
 0x287   : > { %s883_s13 = smov %s625_s14  ;;  %s884_s14 = smov %s746_s17 }
 0x288   : > { %s885_s15 = smov %s715_s24  ;;  %19 = sbr.rel (!%p17_p7) target bundleno = 6 (0x6), region = 81 }
 0x28f   :  { %335 = vsyncpa [#allocation3], 1 }
 0x290   :  { %337 = vsyncpa [#allocation3 + $0x1], 1 }
 0x291   :  { %338 = vsyncpa [#allocation6], 1 }
 0x292   :  { %339 = vsyncpa [#allocation4], 1 }
 0x293   :  { %341 = vsyncpa [#allocation4 + $0x1], 1 }

</bundles_post_ra>
